<compile_context>
chip_gen: v7x
topology: tpu7x:2x2x1
jax: 0.10.0
libtpu: 0.0.40
codegen_flags: <defaults>
</compile_context>

<pallas_src>
import functools

import numpy as np
import jax
import jax.numpy as jnp
from jax.experimental import pallas as pl
from jax.experimental.pallas import tpu as pltpu

LANE = 128


def _round_up(n, m):
    return (n + m - 1) // m * m


def _pick_batch_tile(batch):
    """batch <= 128: single minimally padded tile.  batch > 128: 128..512-row tiles,
    guaranteeing grid >= 2 (per-step overhead amortized; both v7x TCs busy)."""
    if batch <= 128:
        return _round_up(max(batch, 1), 8)
    half = _round_up((batch + 1) // 2, 128)
    return min(512, half)


def _resident_spec(shape):
    """Full block, constant index -> DMA'd once, stays in VMEM across the grid.
    Single-buffered: the block never changes, so a second buffer would be pure waste."""
    idx = lambda i: (0,) * len(shape)
    try:
        return pl.BlockSpec(shape, idx, pipeline_mode=pl.Buffered(1))
    except Exception:  # older jax without pipeline_mode / Buffered
        return pl.BlockSpec(shape, idx)


# ---------------------------------------------------------------- kernel ----
def _make_kernel(apply_scale: bool):
    def kernel(x_ref, g_ref, w1x_ref, w1g_ref, b1_ref,
               w2_ref, b2_ref, w3_ref, b3_ref, *refs):
        if apply_scale:
            scale_ref, out_ref = refs
        else:
            (out_ref,) = refs

        # Layer 1: cat([x, g], 1) @ W1^T == x @ W1x + g @ W1g   (bf16 in, f32 acc)
        h1 = jnp.dot(x_ref[...], w1x_ref[...], preferred_element_type=jnp.float32)
        h1 = h1 + jnp.dot(g_ref[...], w1g_ref[...], preferred_element_type=jnp.float32)
        h1 = jnp.maximum(h1 + b1_ref[...], 0.0)

        # Layer 2: Linear + ReLU
        h2 = jnp.dot(h1.astype(jnp.bfloat16), w2_ref[...],
                     preferred_element_type=jnp.float32)
        h2 = jnp.maximum(h2 + b2_ref[...], 0.0)

        # Layer 3: Linear + tanh (max_action = 1.0), optional goal-space scale
        a = jnp.dot(h2.astype(jnp.bfloat16), w3_ref[...],
                    preferred_element_type=jnp.float32)
        a = jnp.tanh(a + b3_ref[...])
        if apply_scale:
            a = scale_ref[...] * a
        out_ref[...] = a.astype(out_ref.dtype)

    return kernel


# --------------------------------------------------------------- wrapper ----
@functools.partial(jax.jit, static_argnames=("action_dim",))
def _forward_jit(x, g, weights, *, action_dim):
    w1x, w1g, b1, w2, b2, w3, b3, scale = weights
    batch, state_dim = x.shape
    goal_dim = g.shape[1]
    n_pad = w3.shape[1]

    tb = _pick_batch_tile(batch)
    b_pad = _round_up(batch, tb)
    if b_pad != batch:
        x = jnp.pad(x, ((0, b_pad - batch), (0, 0)))
        g = jnp.pad(g, ((0, b_pad - batch), (0, 0)))
    # bf16 inputs: half-width batch-tile DMA, no per-tile VPU cast (fuses with the pad).
    x = x.astype(jnp.bfloat16)
    g = g.astype(jnp.bfloat16)

    apply_scale = scale is not None
    kernel = _make_kernel(apply_scale)

    in_specs = [
        pl.BlockSpec((tb, state_dim), lambda i: (i, 0)),   # x batch tile
        pl.BlockSpec((tb, goal_dim), lambda i: (i, 0)),    # g batch tile
        _resident_spec(w1x.shape), _resident_spec(w1g.shape), _resident_spec(b1.shape),
        _resident_spec(w2.shape), _resident_spec(b2.shape),
        _resident_spec(w3.shape), _resident_spec(b3.shape),
    ]
    args = [x, g, w1x, w1g, b1, w2, b2, w3, b3]
    if apply_scale:
        in_specs.append(_resident_spec(scale.shape))
        args.append(scale)

    out = pl.pallas_call(
        kernel,
        out_shape=jax.ShapeDtypeStruct((b_pad, n_pad), jnp.bfloat16),
        grid=(b_pad // tb,),
        in_specs=in_specs,
        out_specs=pl.BlockSpec((tb, n_pad), lambda i: (i, 0)),
        compiler_params=pltpu.CompilerParams(
            dimension_semantics=("parallel",),
            vmem_limit_bytes=32 * 1024 * 1024,
        ),
    )(*args)
    # Slice + f32 upcast fuse with the pallas_call epilogue under jit.
    return out[:batch, :action_dim].astype(jnp.float32)


def manager_actor_forward(x, g, prepared):
    """x: (B, state_dim) f32, g: (B, goal_dim) f32 -> (B, action_dim) f32."""
    weights, action_dim = prepared
    return _forward_jit(x, g, weights, action_dim=action_dim)


# ------------------------------------------------------------ param prep ----
def init_params(key, state_dim, goal_dim, action_dim, hidden=300, scale=None):
    """PyTorch-layout params: W (out, in), b (out,). Deterministic fan_in init."""
    ks = jax.random.split(key, 6)
    in_dim = state_dim + goal_dim

    def lin(kw, kb, fan_in, fan_out):
        bound = float(fan_in) ** -0.5
        w = jax.random.uniform(kw, (fan_out, fan_in), jnp.float32, -bound, bound)
        b = jax.random.uniform(kb, (fan_out,), jnp.float32, -bound, bound)
        return w, b

    w1, b1 = lin(ks[0], ks[1], in_dim, hidden)
    w2, b2 = lin(ks[2], ks[3], hidden, hidden)
    w3, b3 = lin(ks[4], ks[5], hidden, action_dim)
    if scale is None:
        scale = jnp.ones((action_dim,), jnp.float32)   # ManagerActor default
    return (w1, b1, w2, b2, w3, b3, scale)


def prepare_params(params, state_dim, goal_dim, action_dim):
    """One-time: transpose to (in, out), split W1, zero-pad dims to 128-multiples,
    cast weights to bf16.  Zero padding leaves numerics unchanged (relu(0)=0, padded
    weight rows/cols are zero; padded output lanes are sliced off)."""
    w1, b1, w2, b2, w3, b3, scale = params
    assert action_dim == state_dim, \
        "ManagerActor scale (state_dim,) requires action_dim == state_dim"
    hidden = w1.shape[0]
    h_pad = _round_up(hidden, LANE)          # 300 -> 384 (do NOT pad to 512)
    n_pad = _round_up(action_dim, LANE)      # 16  -> 128

    w1_t = w1.T                              # (state+goal, hidden)
    pad_h = ((0, 0), (0, h_pad - hidden))
    w1x = jnp.pad(w1_t[:state_dim], pad_h).astype(jnp.bfloat16)
    w1g = jnp.pad(w1_t[state_dim:], pad_h).astype(jnp.bfloat16)
    b1p = jnp.pad(b1, (0, h_pad - hidden)).reshape(1, h_pad).astype(jnp.float32)

    w2p = jnp.pad(w2.T, ((0, h_pad - hidden), (0, h_pad - hidden))).astype(jnp.bfloat16)
    b2p = jnp.pad(b2, (0, h_pad - hidden)).reshape(1, h_pad).astype(jnp.float32)

    w3p = jnp.pad(w3.T, ((0, h_pad - hidden), (0, n_pad - action_dim))).astype(jnp.bfloat16)
    b3p = jnp.pad(b3, (0, n_pad - action_dim)).reshape(1, n_pad).astype(jnp.float32)

    if bool(np.all(np.asarray(scale) == 1.0)):
        scale_p = None                       # fold away the multiply (HIRO default)
    else:
        scale_p = jnp.pad(scale.astype(jnp.float32),
                          (0, n_pad - action_dim)).reshape(1, n_pad)
    weights = (w1x, w1g, b1p, w2p, b2p, w3p, b3p, scale_p)
    return (weights, action_dim)


# ------------------------------------------------------------- references ---
def reference_forward_f32(x, g, params):
    """Exact PyTorch math in f32 (loose check: bf16 quantization tolerance)."""
    w1, b1, w2, b2, w3, b3, scale = params
    xg = jnp.concatenate([x, g], axis=1)
    h1 = jnp.maximum(xg @ w1.T + b1, 0.0)
    h2 = jnp.maximum(h1 @ w2.T + b2, 0.0)
    return scale * jnp.tanh(h2 @ w3.T + b3)


def reference_forward_prepared(x, g, prepared):
    """Same bf16-weight / bf16-activation / f32-accumulate / bf16-output math path
    as the kernel (tight check)."""
    weights, action_dim = prepared
    w1x, w1g, b1, w2, b2, w3, b3, scale = weights
    xb = x.astype(jnp.bfloat16)
    gb = g.astype(jnp.bfloat16)
    h1 = (jnp.dot(xb, w1x, preferred_element_type=jnp.float32)
          + jnp.dot(gb, w1g, preferred_element_type=jnp.float32))
    h1 = jnp.maximum(h1 + b1, 0.0)
    h2 = jnp.maximum(jnp.dot(h1.astype(jnp.bfloat16), w2,
                             preferred_element_type=jnp.float32) + b2, 0.0)
    a = jnp.tanh(jnp.dot(h2.astype(jnp.bfloat16), w3,
                         preferred_element_type=jnp.float32) + b3)
    if scale is not None:
        a = scale * a
    a = a.astype(jnp.bfloat16).astype(jnp.float32)   # kernel emits bf16 output
    return a[:, :action_dim]


# ------------------------------------------------------------------ main ----
if __name__ == "__main__":
    state_dim, goal_dim, action_dim = 16, 8, 16   # HIRO: goal space == state space

    key = jax.random.PRNGKey(0)
    kp, kx, kg = jax.random.split(key, 3)
    # Non-trivial goal-space scale (HIRO-style bounds) to exercise the scale path.
    goal_scale = jnp.linspace(0.5, 2.0, action_dim).astype(jnp.float32)
    raw_params = init_params(kp, state_dim, goal_dim, action_dim, scale=goal_scale)
    prepared = prepare_params(raw_params, state_dim, goal_dim, action_dim)

    for batch in (8, 384):   # small latency path (1 tile) and multi-tile path (grid=2)
        kxb, kgb = jax.random.split(jax.random.fold_in(kx, batch), 2)
        x = jax.random.normal(kxb, (batch, state_dim), jnp.float32)
        g = jax.random.normal(kgb, (batch, goal_dim), jnp.float32)

        out = manager_actor_forward(x, g, prepared)
        out = jax.block_until_ready(out)
        assert out.shape == (batch, action_dim)

        # Tight check: identical bf16 math path (incl. bf16 output rounding).
        ref_tight = reference_forward_prepared(x, g, prepared)
        assert jnp.allclose(out, ref_tight, atol=1e-2, rtol=1e-2), \
            f"batch={batch}: mismatch vs bf16-path JAX reference"

        # Loose check: original f32 PyTorch semantics (bf16 quantization tolerance).
        ref_f32 = reference_forward_f32(x, g, raw_params)
        assert jnp.allclose(out, ref_f32, atol=5e-2, rtol=5e-2), \
            f"batch={batch}: mismatch vs f32 PyTorch-semantics reference"

    print("KERNEL_OK")
</pallas_src>

<mosaic_0001>
module attributes {stable_mosaic.version = 11 : i64} {
  func.func @kernel(%arg0: i32, %arg1: memref<8x16xbf16, #tpu.memory_space<vmem>>, %arg2: memref<8x8xbf16, #tpu.memory_space<vmem>>, %arg3: memref<16x384xbf16, #tpu.memory_space<vmem>>, %arg4: memref<8x384xbf16, #tpu.memory_space<vmem>>, %arg5: memref<1x384xf32, #tpu.memory_space<vmem>>, %arg6: memref<384x384xbf16, #tpu.memory_space<vmem>>, %arg7: memref<1x384xf32, #tpu.memory_space<vmem>>, %arg8: memref<384x128xbf16, #tpu.memory_space<vmem>>, %arg9: memref<1x128xf32, #tpu.memory_space<vmem>>, %arg10: memref<1x128xf32, #tpu.memory_space<vmem>>, %arg11: memref<8x128xbf16, #tpu.memory_space<vmem>>) attributes {dimension_semantics = [#tpu.dimension_semantics<parallel>], iteration_bounds = array<i64: 1>, scalar_prefetch = 0 : i64, scratch_operands = 0 : i64, tpu.core_type = #tpu.core_type<tc>, window_params = [{transform_indices = @transform_0, window_bounds = array<i64: 8, 16>}, {transform_indices = @transform_1, window_bounds = array<i64: 8, 8>}, {pipeline_mode = #tpu.pipeline_mode<synchronous>, transform_indices = @transform_2, window_bounds = array<i64: 16, 384>}, {pipeline_mode = #tpu.pipeline_mode<synchronous>, transform_indices = @transform_3, window_bounds = array<i64: 8, 384>}, {pipeline_mode = #tpu.pipeline_mode<synchronous>, transform_indices = @transform_4, window_bounds = array<i64: 1, 384>}, {pipeline_mode = #tpu.pipeline_mode<synchronous>, transform_indices = @transform_5, window_bounds = array<i64: 384, 384>}, {pipeline_mode = #tpu.pipeline_mode<synchronous>, transform_indices = @transform_6, window_bounds = array<i64: 1, 384>}, {pipeline_mode = #tpu.pipeline_mode<synchronous>, transform_indices = @transform_7, window_bounds = array<i64: 384, 128>}, {pipeline_mode = #tpu.pipeline_mode<synchronous>, transform_indices = @transform_8, window_bounds = array<i64: 1, 128>}, {pipeline_mode = #tpu.pipeline_mode<synchronous>, transform_indices = @transform_9, window_bounds = array<i64: 1, 128>}, {transform_indices = @transform_10, window_bounds = array<i64: 8, 128>}]} {
    %c0 = arith.constant 0 : index
    %c0_0 = arith.constant 0 : index
    %0 = vector.load %arg1[%c0, %c0_0] : memref<8x16xbf16, #tpu.memory_space<vmem>>, vector<8x16xbf16>
    %c0_1 = arith.constant 0 : index
    %c0_2 = arith.constant 0 : index
    %1 = vector.load %arg3[%c0_1, %c0_2] : memref<16x384xbf16, #tpu.memory_space<vmem>>, vector<16x384xbf16>
    %cst = arith.constant dense<0.000000e+00> : vector<8x384xf32>
    %2 = tpu.matmul %0, %1, %cst {dimension_numbers = #tpu.dot_dimension_numbers<[1], [0], [0], [1], [0, 0, 1, 1], [], []>} : vector<8x16xbf16>, vector<16x384xbf16>, vector<8x384xf32> -> vector<8x384xf32>
    %c0_3 = arith.constant 0 : index
    %c0_4 = arith.constant 0 : index
    %3 = vector.load %arg2[%c0_3, %c0_4] : memref<8x8xbf16, #tpu.memory_space<vmem>>, vector<8x8xbf16>
    %c0_5 = arith.constant 0 : index
    %c0_6 = arith.constant 0 : index
    %4 = vector.load %arg4[%c0_5, %c0_6] : memref<8x384xbf16, #tpu.memory_space<vmem>>, vector<8x384xbf16>
    %cst_7 = arith.constant dense<0.000000e+00> : vector<8x384xf32>
    %5 = tpu.matmul %3, %4, %cst_7 {dimension_numbers = #tpu.dot_dimension_numbers<[1], [0], [0], [1], [0, 0, 1, 1], [], []>} : vector<8x8xbf16>, vector<8x384xbf16>, vector<8x384xf32> -> vector<8x384xf32>
    %6 = arith.addf %2, %5 : vector<8x384xf32>
    %c0_8 = arith.constant 0 : index
    %c0_9 = arith.constant 0 : index
    %7 = vector.load %arg5[%c0_8, %c0_9] : memref<1x384xf32, #tpu.memory_space<vmem>>, vector<1x384xf32>
    %8 = vector.broadcast %7 : vector<1x384xf32> to vector<8x384xf32>
    %9 = arith.addf %6, %8 : vector<8x384xf32>
    %cst_10 = arith.constant 0.000000e+00 : f32
    %10 = vector.broadcast %cst_10 : f32 to vector<8x384xf32>
    %11 = arith.maximumf %9, %10 : vector<8x384xf32>
    %12 = arith.truncf %11 : vector<8x384xf32> to vector<8x384xbf16>
    %c0_11 = arith.constant 0 : index
    %c0_12 = arith.constant 0 : index
    %13 = vector.load %arg6[%c0_11, %c0_12] : memref<384x384xbf16, #tpu.memory_space<vmem>>, vector<384x384xbf16>
    %cst_13 = arith.constant dense<0.000000e+00> : vector<8x384xf32>
    %14 = tpu.matmul %12, %13, %cst_13 {dimension_numbers = #tpu.dot_dimension_numbers<[1], [0], [0], [1], [0, 0, 1, 1], [], []>} : vector<8x384xbf16>, vector<384x384xbf16>, vector<8x384xf32> -> vector<8x384xf32>
    %c0_14 = arith.constant 0 : index
    %c0_15 = arith.constant 0 : index
    %15 = vector.load %arg7[%c0_14, %c0_15] : memref<1x384xf32, #tpu.memory_space<vmem>>, vector<1x384xf32>
    %16 = vector.broadcast %15 : vector<1x384xf32> to vector<8x384xf32>
    %17 = arith.addf %14, %16 : vector<8x384xf32>
    %cst_16 = arith.constant 0.000000e+00 : f32
    %18 = vector.broadcast %cst_16 : f32 to vector<8x384xf32>
    %19 = arith.maximumf %17, %18 : vector<8x384xf32>
    %20 = arith.truncf %19 : vector<8x384xf32> to vector<8x384xbf16>
    %c0_17 = arith.constant 0 : index
    %c0_18 = arith.constant 0 : index
    %21 = vector.load %arg8[%c0_17, %c0_18] : memref<384x128xbf16, #tpu.memory_space<vmem>>, vector<384x128xbf16>
    %cst_19 = arith.constant dense<0.000000e+00> : vector<8x128xf32>
    %22 = tpu.matmul %20, %21, %cst_19 {dimension_numbers = #tpu.dot_dimension_numbers<[1], [0], [0], [1], [0, 0, 1, 1], [], []>} : vector<8x384xbf16>, vector<384x128xbf16>, vector<8x128xf32> -> vector<8x128xf32>
    %c0_20 = arith.constant 0 : index
    %c0_21 = arith.constant 0 : index
    %23 = vector.load %arg9[%c0_20, %c0_21] : memref<1x128xf32, #tpu.memory_space<vmem>>, vector<1x128xf32>
    %24 = vector.broadcast %23 : vector<1x128xf32> to vector<8x128xf32>
    %25 = arith.addf %22, %24 : vector<8x128xf32>
    %26 = math.tanh %25 : vector<8x128xf32>
    %c0_22 = arith.constant 0 : index
    %c0_23 = arith.constant 0 : index
    %27 = vector.load %arg10[%c0_22, %c0_23] : memref<1x128xf32, #tpu.memory_space<vmem>>, vector<1x128xf32>
    %28 = vector.broadcast %27 : vector<1x128xf32> to vector<8x128xf32>
    %29 = arith.mulf %28, %26 : vector<8x128xf32>
    %30 = arith.truncf %29 : vector<8x128xf32> to vector<8x128xbf16>
    %c0_24 = arith.constant 0 : index
    %c0_25 = arith.constant 0 : index
    %31 = vector.load %arg11[%c0_24, %c0_25] : memref<8x128xbf16, #tpu.memory_space<vmem>>, vector<8x128xbf16>
    tpu.vector_store %arg11[%c0_24, %c0_25], %30 {strides = array<i32>} : memref<8x128xbf16, #tpu.memory_space<vmem>>, vector<8x128xbf16>,
    return
  }
  func.func @transform_0(%arg0: i32) -> (i32, i32) {
    %c0_i32 = arith.constant 0 : i32
    %c0_i32_0 = arith.constant 0 : i32
    return %arg0, %c0_i32 : i32, i32
  }
  func.func @transform_1(%arg0: i32) -> (i32, i32) {
    %c0_i32 = arith.constant 0 : i32
    %c0_i32_0 = arith.constant 0 : i32
    return %arg0, %c0_i32 : i32, i32
  }
  func.func @transform_2(%arg0: i32) -> (i32, i32) {
    %c0_i32 = arith.constant 0 : i32
    %c0_i32_0 = arith.constant 0 : i32
    %c0_i32_1 = arith.constant 0 : i32
    return %c0_i32, %c0_i32_0 : i32, i32
  }
  func.func @transform_3(%arg0: i32) -> (i32, i32) {
    %c0_i32 = arith.constant 0 : i32
    %c0_i32_0 = arith.constant 0 : i32
    %c0_i32_1 = arith.constant 0 : i32
    return %c0_i32, %c0_i32_0 : i32, i32
  }
  func.func @transform_4(%arg0: i32) -> (i32, i32) {
    %c0_i32 = arith.constant 0 : i32
    %c0_i32_0 = arith.constant 0 : i32
    %c0_i32_1 = arith.constant 0 : i32
    return %c0_i32, %c0_i32_0 : i32, i32
  }
  func.func @transform_5(%arg0: i32) -> (i32, i32) {
    %c0_i32 = arith.constant 0 : i32
    %c0_i32_0 = arith.constant 0 : i32
    %c0_i32_1 = arith.constant 0 : i32
    return %c0_i32, %c0_i32_0 : i32, i32
  }
  func.func @transform_6(%arg0: i32) -> (i32, i32) {
    %c0_i32 = arith.constant 0 : i32
    %c0_i32_0 = arith.constant 0 : i32
    %c0_i32_1 = arith.constant 0 : i32
    return %c0_i32, %c0_i32_0 : i32, i32
  }
  func.func @transform_7(%arg0: i32) -> (i32, i32) {
    %c0_i32 = arith.constant 0 : i32
    %c0_i32_0 = arith.constant 0 : i32
    %c0_i32_1 = arith.constant 0 : i32
    return %c0_i32, %c0_i32_0 : i32, i32
  }
  func.func @transform_8(%arg0: i32) -> (i32, i32) {
    %c0_i32 = arith.constant 0 : i32
    %c0_i32_0 = arith.constant 0 : i32
    %c0_i32_1 = arith.constant 0 : i32
    return %c0_i32, %c0_i32_0 : i32, i32
  }
  func.func @transform_9(%arg0: i32) -> (i32, i32) {
    %c0_i32 = arith.constant 0 : i32
    %c0_i32_0 = arith.constant 0 : i32
    %c0_i32_1 = arith.constant 0 : i32
    return %c0_i32, %c0_i32_0 : i32, i32
  }
  func.func @transform_10(%arg0: i32) -> (i32, i32) {
    %c0_i32 = arith.constant 0 : i32
    %c0_i32_0 = arith.constant 0 : i32
    return %arg0, %c0_i32 : i32, i32
  }
}

</mosaic_0001>

<bundles_post_ra>
// kernel: _forward_jit.1
= control target key start
LH: loop header
LB: loop body
LE: loop exit
PB: predicated region body
PF: predicated region fallthrough
CT: control target
= control target key end

     0   :  { %15 = vsyncpa [#allocation3], 0  ;;  %s1902_s0 = inlined_call_operand.vmem [shape: bf16[8,16], index: 0, kind: input, shape index: {}]   ;;  %s1903_s1 = inlined_call_operand.vmem [shape: bf16[8,8], index: 1, kind: input, shape index: {}]   ;;  %s1904_s2 = inlined_call_operand.vmem [shape: bf16[16,384], index: 2, kind: input, shape index: {}]   ;;  %s1905_s3 = inlined_call_operand.hbm [shape: bf16[8,384], index: 3, kind: input, shape index: {}]   ;;  %s1906_s4 = inlined_call_operand.vmem [shape: f32[1,384], index: 4, kind: input, shape index: {}]   ;;  %s1907_s5 = inlined_call_operand.hbm [shape: bf16[384,384], index: 5, kind: input, shape index: {}]   ;;  %s1908_s6 = inlined_call_operand.vmem [shape: f32[1,384], index: 6, kind: input, shape index: {}]   ;;  %s1909_s7 = inlined_call_operand.hbm [shape: bf16[384,128], index: 7, kind: input, shape index: {}]   ;;  %s1910_s8 = inlined_call_operand.vmem [shape: f32[1,128], index: 8, kind: input, shape index: {}]   ;;  %s1911_s9 = inlined_call_operand.vmem [shape: f32[1,128], index: 9, kind: input, shape index: {}]   ;;  %s1912_s10 = inlined_call_operand.vmem [shape: bf16[8,128], index: 10, kind: output, shape index: {}]  }
   0x1   :  { %16 = vsyncpa [#allocation5], 0  ;;  %s1716_s13 = smov [#allocation4]   ;;  %s1646_s17 = scalar_lea.hbm %s1907_s5, 9216 }
   0x2   :  { %s40_s14 = sshll.u32 %s1716_s13, 4  ;;  %p1647_p0 = scmp.ne.s32.totalorder %s1907_s5, %s1646_s17  ;;  %s41_s14 = int_to_ptr.vmem [resolvable:$true] %s40_s14 }
   0x3   :  { %p1650_p1 = scmp.lt.u32.totalorder %s1646_s17, %s1907_s5 }
   0x5   :  { %p1652_p2 = pnand %p1650_p1, %p1647_p0 }
   0x7   :  { %1655 = shalt.err (!%p1652_p2)
}
   0x8   :  { %s1656_s22 = scalar_lea.vmem %s41_s14, 9216  ;;  %p1661_p4 = scmp.lt.s32.totalorder %s41_s14, %s41_s14 }
   0x9   :  { %p1657_p3 = scmp.ne.s32.totalorder %s41_s14, %s1656_s22  ;;  %p1662_p5 = scmp.lt.s32.totalorder %s1656_s22, %s1656_s22 }
   0xb   :  { %p1663_p6 = por %p1662_p5, %p1661_p4 }
   0xd   :  { %p1664_p7 = pnand %p1663_p6, %p1657_p3 }
   0xf   :  { %1667 = shalt.err (!%p1664_p7)
}
  0x10   :  { %s1717_s23 = smov 192   ;;  %s1718_s24 = smov 12  }
  0x11   :  { %46 = dma.hbm_to_vmem [thread:$0]  %s1907_s5, 9216, %s41_s14, [#allocation5], %s1717_s23, %s1717_s23, %s1718_s24  }
  0x12   :  { %s1719_s27 = smov [#allocation2]   ;;  %s1720_s29 = smov [#allocation6]  }
  0x13   :  { %s29_s28 = sshll.u32 %s1719_s27, 4  ;;  %s54_s30 = sshll.u32 %s1720_s29, 4  ;;  %s30_s28 = int_to_ptr.vmem [resolvable:$true] %s29_s28  ;;  %s55_s30 = int_to_ptr.vmem [resolvable:$true] %s54_s30 }
  0x14   :  { %s1668_s13 = scalar_lea.hbm %s1905_s3, 192 }
  0x15   :  { %p1669_p8 = scmp.ne.s32.totalorder %s1905_s3, %s1668_s13  ;;  %p1672_p9 = scmp.lt.u32.totalorder %s1668_s13, %s1905_s3 }
  0x17   :  { %p1674_p10 = pnand %p1672_p9, %p1669_p8 }
  0x19   :  { %1677 = shalt.err (!%p1674_p10)
}
  0x1a   :  { %s1678_s5 = scalar_lea.vmem %s30_s28, 192  ;;  %p1683_p12 = scmp.lt.s32.totalorder %s30_s28, %s30_s28 }
  0x1b   :  { %p1679_p11 = scmp.ne.s32.totalorder %s30_s28, %s1678_s5  ;;  %p1684_p13 = scmp.lt.s32.totalorder %s1678_s5, %s1678_s5 }
  0x1d   :  { %p1685_p0 = por %p1684_p13, %p1683_p12 }
  0x1f   :  { %p1686_p1 = pnand %p1685_p0, %p1679_p11 }
  0x21   :  { %1689 = shalt.err (!%p1686_p1)
}
  0x22   :  { %32 = dma.hbm_to_vmem [thread:$0]  %s1905_s3, 192, %s30_s28, [#allocation3]  }
  0x23   :  { %s1690_s22 = scalar_lea.hbm %s1909_s7, 3072 }
  0x24   :  { %p1691_p2 = scmp.ne.s32.totalorder %s1909_s7, %s1690_s22  ;;  %p1694_p3 = scmp.lt.u32.totalorder %s1690_s22, %s1909_s7 }
  0x26   :  { %p1696_p4 = pnand %p1694_p3, %p1691_p2 }
  0x28   :  { %1699 = shalt.err (!%p1696_p4)
}
  0x29   :  { %s1700_s27 = scalar_lea.vmem %s55_s30, 3072  ;;  %p1705_p6 = scmp.lt.s32.totalorder %s55_s30, %s55_s30 }
  0x2a   :  { %p1701_p5 = scmp.ne.s32.totalorder %s55_s30, %s1700_s27  ;;  %p1706_p7 = scmp.lt.s32.totalorder %s1700_s27, %s1700_s27 }
  0x2c   :  { %p1707_p8 = por %p1706_p7, %p1705_p6 }
  0x2e   :  { %p1708_p9 = pnand %p1707_p8, %p1701_p5 }
  0x30   :  { %1711 = shalt.err (!%p1708_p9)
}
  0x31   :  { %s1721_s3 = smov 64   ;;  %s1722_s28 = smov 4  }
  0x32   :  { %60 = dma.hbm_to_vmem [thread:$0]  %s1909_s7, 3072, %s55_s30, [#allocation5], %s1721_s3, %s1721_s3, %s1722_s28  }
  0x33   :  { %1712 = dma.done.wait [#allocation3], 192  }
  0x34   :  { %1713 = vsyncadd [#allocation3], 4294967104 }
  0x35   :  { %1714 = dma.done.wait [#allocation5], 12288  }
  0x36   :  { %1715 = vsyncadd [#allocation5], 4294955008  ;;  %v1723_v0 = vmov 0   ;;  %v81_v1 = vld [vmem:[#allocation2] sm:$0xff]  ;;  %vm95_vm0 = vcmask 1043456   ;;  %vm91_vm1 = vcmask 64512  }
  0x37   :  { %137 = vmatprep.mubr.bf16.mxu1 %v1723_v0  ;;  %v1275_v2 = vcombine.high %v81_v1, %v81_v1  ;;  %v1274_v3 = vcombine.low %v81_v1, %v81_v1  ;;  %v1519_v4 = vld [vmem:[#allocation2 + $0x8] ss:$0 sps:$4 sm:$0xff]   ;;  %v1522_v7 = vld [vmem:[%s1904_s2 + $0x4] ss:$12 sps:$4 sm:$0xff]   ;;  %v1724_v8 = vmov 0.0   ;;  %vm1725_vm2 = vmmov 0  }
  0x38   :  { %v80_v5 = vld [vmem:[%s1903_s1] sm:$0xf]  ;;  %v103_v9 = vsel %vm95_vm0, %v1519_v4, 0  ;;  %v1524_v10 = vld [vmem:[#allocation4 + $0x4] ss:$12 sps:$4 sm:$0xff]   ;;  %vm202_vm3 = vcmask 130048  }
  0x39   :  { %1277 = vmatprep.subr.msk.bf16.mxu1 %vm95_vm0, %v1275_v2  ;;  %v97_v6 = vsel %vm95_vm0, %v1274_v3, 0  ;;  %v1526_v11 = vld [vmem:[#allocation4] ss:$12 sps:$4 sm:$0xff]   ;;  %v1527_v12 = vld [vmem:[#allocation4 + $0x1c] ss:$12 sps:$4 sm:$0xff]   ;;  %810 = vmatprep.subr.bf16.mxu0 %v1524_v10  ;;  %v289_v3 = vlaneseq }
  0x3a   :  { %106 = vmatpush1.bf16.msra.mxu1 %v97_v6  ;;  %811 = vmatpush1.bf16.msra.mxu0 %v1526_v11  ;;  %v1529_v13 = vld [vmem:[#allocation4 + $0x18] ss:$12 sps:$4 sm:$0xff]   ;;  %v1530_v14 = vld [vmem:[#allocation4 + $0x34] ss:$12 sps:$4 sm:$0xff]   ;;  %v1520_v15 = vld [vmem:[%s1904_s2] ss:$12 sps:$4 sm:$0xff]  }
  0x3b   :  { %1449 = vmatprep.subr.bf16.mxu1 %v1724_v8  ;;  %812 = vmatprep.subr.bf16.mxu0 %v1527_v12  ;;  %v1532_v16 = vld [vmem:[#allocation4 + $0x30] ss:$12 sps:$4 sm:$0xff]   ;;  %v1533_v17 = vld [vmem:[#allocation4 + $0x4c] ss:$12 sps:$4 sm:$0xff]   ;;  %v1535_v18 = vld [vmem:[#allocation4 + $0x48] ss:$12 sps:$4 sm:$0xff]  }
  0x3c   :  { %v75_v19 = vld [vmem:[%s1902_s0] sm:$0xf]  ;;  %v1536_v20 = vld [vmem:[#allocation4 + $0x64] ss:$12 sps:$4 sm:$0xff]   ;;  %v1538_v22 = vld [vmem:[#allocation4 + $0x60] ss:$12 sps:$4 sm:$0xff]  }
  0x3d   :  { %1278 = vmatmul.mubr.msk.bf16.vlgmr.msra.gmra.mrb[0].mxu1 %vm91_vm1, %v80_v5  ;;  %v1523_v21 = vld [vmem:[%s1904_s2 + $0x8] ss:$12 sps:$4 sm:$0xff]   ;;  %v1539_v23 = vld [vmem:[#allocation4 + $0x7c] ss:$12 sps:$4 sm:$0xff]   ;;  %v1542_v26 = vld [vmem:[#allocation4 + $0x94] ss:$12 sps:$4 sm:$0xff]  }
  0x3e   :  { %1450 = vmatpush3.bf16.msra.mxu1 %v103_v9  ;;  %1451 = vmatprep.mubr.msk.bf16.mxu1 %vm1725_vm2, %v1724_v8  ;;  %v1550_v24 = vld [vmem:[#allocation4 + $0xc8] ss:$12 sps:$4 sm:$0xff]   ;;  %v1541_v25 = vld [vmem:[#allocation4 + $0x78] ss:$12 sps:$4 sm:$0xff]   ;;  %v1544_v28 = vld [vmem:[#allocation4 + $0x90] ss:$12 sps:$4 sm:$0xff]  }
  0x3f   :  { %206 = vmatprep.subr.bf16.mxu1 %v1522_v7  ;;  %813 = vmatpush1.bf16.msra.mxu0 %v1529_v13  ;;  %v1552_v27 = vld [vmem:[#allocation4 + $0x8] ss:$12 sps:$4 sm:$0xff]   ;;  %v1555_v29 = vld [vmem:[#allocation4 + $0xe0] ss:$12 sps:$4 sm:$0xff]   ;;  %v1548_v33 = vld [vmem:[#allocation4 + $0xc4] ss:$12 sps:$4 sm:$0xff]  }
  0x40   :  { %814 = vmatprep.subr.bf16.mxu0 %v1530_v14  ;;  %v1545_v30 = vld [vmem:[#allocation4 + $0xac] ss:$12 sps:$4 sm:$0xff]   ;;  %v1547_v32 = vld [vmem:[#allocation4 + $0xa8] ss:$12 sps:$4 sm:$0xff]   ;;  %v1561_v39 = vld [vmem:[#allocation4 + $0xf0] ss:$12 sps:$4 sm:$0xff]  }
  0x41   :  { %v1557_v31 = vld [vmem:[#allocation4 + $0x20] ss:$12 sps:$4 sm:$0xff]   ;;  %v1553_v35 = vld [vmem:[#allocation4 + $0xdc] ss:$12 sps:$4 sm:$0xff]   ;;  %v1556_v36 = vld [vmem:[#allocation4 + $0xd8] ss:$12 sps:$4 sm:$0xff]  }
  0x42   :  { %v1551_v34 = vld [vmem:[#allocation4 + $0xc0] ss:$12 sps:$4 sm:$0xff]   ;;  %v1560_v38 = vld [vmem:[#allocation4 + $0xf8] ss:$12 sps:$4 sm:$0xff]   ;;  %v1565_v42 = vld [vmem:[#allocation4 + $0x110] ss:$12 sps:$4 sm:$0xff]  }
  0x43   :  { %815 = vmatpush1.bf16.msra.mxu0 %v1532_v16  ;;  %v1558_v37 = vld [vmem:[#allocation4 + $0xf4] ss:$12 sps:$4 sm:$0xff]   ;;  %v1562_v40 = vld [vmem:[#allocation4 + $0x38] ss:$12 sps:$4 sm:$0xff]   ;;  %v1567_v44 = vld [vmem:[#allocation4 + $0x50] ss:$12 sps:$4 sm:$0xff]  }
  0x44   :  { %816 = vmatprep.subr.bf16.mxu0 %v1533_v17  ;;  %v1563_v41 = vld [vmem:[#allocation4 + $0x10c] ss:$12 sps:$4 sm:$0xff]   ;;  %v1566_v43 = vld [vmem:[#allocation4 + $0x108] ss:$12 sps:$4 sm:$0xff]   ;;  %v1568_v45 = vld [vmem:[#allocation4 + $0x124] ss:$12 sps:$4 sm:$0xff]  }
  0x45   :  { %1452 = vmatmul.mubr.msk.bf16.vlgmr.msra.gmra.mrb[4].mxu1 %vm91_vm1, %v80_v5  ;;  %v1570_v46 = vld [vmem:[#allocation4 + $0x128] ss:$12 sps:$4 sm:$0xff]   ;;  %v1571_v47 = vld [vmem:[#allocation4 + $0x120] ss:$12 sps:$4 sm:$0xff]   ;;  %v1576_v51 = vld [vmem:[#allocation4 + $0x138] ss:$12 sps:$4 sm:$0xff]  }
  0x46   :  { %207 = vmatpush1.bf16.msra.mxu1 %v1520_v15  ;;  %238 = vmatprep.mubr.bf16.mxu1 %v1723_v0  ;;  %v1572_v48 = vld [vmem:[#allocation4 + $0x68] ss:$12 sps:$4 sm:$0xff]   ;;  %v1575_v50 = vld [vmem:[#allocation4 + $0x140] ss:$12 sps:$4 sm:$0xff]   ;;  %v1580_v54 = vld [vmem:[#allocation4 + $0x158] ss:$12 sps:$4 sm:$0xff]  }
  0x47   :  { %1455 = vmatprep.subr.bf16.mxu1 %v1724_v8  ;;  %817 = vmatpush1.bf16.msra.mxu0 %v1535_v18  ;;  %v1573_v49 = vld [vmem:[#allocation4 + $0x13c] ss:$12 sps:$4 sm:$0xff]   ;;  %v1577_v52 = vld [vmem:[#allocation4 + $0x80] ss:$12 sps:$4 sm:$0xff]   ;;  %v1582_v56 = vld [vmem:[#allocation4 + $0x98] ss:$12 sps:$4 sm:$0xff]  }
  0x48   :  { %818 = vmatprep.subr.bf16.mxu0 %v1536_v20  ;;  %v1578_v53 = vld [vmem:[#allocation4 + $0x154] ss:$12 sps:$4 sm:$0xff]   ;;  %v1581_v55 = vld [vmem:[#allocation4 + $0x150] ss:$12 sps:$4 sm:$0xff]   ;;  %v1583_v57 = vld [vmem:[#allocation4 + $0x16c] ss:$12 sps:$4 sm:$0xff]  }
  0x49   :  { %v1585_v58 = vld [vmem:[#allocation4 + $0x170] ss:$12 sps:$4 sm:$0xff]   ;;  %v1586_v59 = vld [vmem:[#allocation4 + $0x168] ss:$12 sps:$4 sm:$0xff]   ;;  %v1845_v4 = vshrl.u32 %v289_v3, 7 }
  0x4a   :  { %v1587_v60 = vld [vmem:[#allocation4 + $0xb0] ss:$12 sps:$4 sm:$0xff]  }
  0x4b   :  { %819 = vmatpush1.bf16.msra.mxu0 %v1538_v22  ;;  %v1590_v61 = vld [vmem:[#allocation4 + $0x184] ss:$12 sps:$4 sm:$0xff]   ;;  %v291_v10 = vsub.s32 0, %v1845_v4  ;;  %v1851_v11 = vld [vmem:[%s1906_s4] sm:$0x7]  ;;  %v295_v12 = vsub.s32 1, %v1845_v4 }
  0x4c   :  { %820 = vmatprep.subr.bf16.mxu0 %v1539_v23  ;;  %v1626_v3 = vld [vmem:[#allocation6 + $0x90] sm:$0xff]  }
  0x4d   :  { %1283 = vmatmul.mubr.msk.bf16.vlgmr.msra.gmra.mrb[8].mxu1 %vm202_vm3, %v75_v19  ;;  %v292_v13 = vrot.slane %v1851_v11, %v291_v10  ;;  %v296_v15 = vrot.slane %v1851_v11, %v295_v12 }
  0x4e   :  { %1456 = vmatpush3.bf16.msra.mxu1 %v1523_v21  ;;  %1457 = vmatprep.mubr.msk.bf16.mxu1 %vm1725_vm2, %v1724_v8 }
  0x4f   :  { %1387 = vmatprep.subr.bf16.mxu1 %v1550_v24  ;;  %821 = vmatpush1.bf16.msra.mxu0 %v1541_v25 }
  0x50   :  { %822 = vmatprep.subr.bf16.mxu0 %v1542_v26 }
  0x53   :  { %823 = vmatpush1.bf16.msra.mxu0 %v1544_v28  ;;  %v1591_v28 = vld [vmem:[#allocation4 + $0x188] ss:$12 sps:$4 sm:$0xff]  }
  0x54   :  { %824 = vmatprep.subr.bf16.mxu0 %v1545_v30 }
  0x55   :  { %1458 = vmatmul.mubr.msk.bf16.vlgmr.msra.gmra.mrb[12].mxu1 %vm202_vm3, %v75_v19 }
  0x56   :  { %1388 = vmatpush3.bf16.msra.mxu1 %v1552_v27  ;;  %v1588_v27 = vld [vmem:[#allocation4 + $0x180] ss:$12 sps:$4 sm:$0xff]  }
  0x57   :  { %1389 = vmatprep.subr.bf16.mxu1 %v1555_v29  ;;  %825 = vmatpush1.bf16.msra.mxu0 %v1547_v32 }
  0x58   :  { %826 = vmatprep.subr.bf16.mxu0 %v1548_v33 }
  0x5a   :  { %1390 = vmatpush3.bf16.msra.mxu1 %v1557_v31  ;;  %v1594_v31 = vld [vmem:[#allocation4 + $0x19c] ss:$12 sps:$4 sm:$0xff]  }
  0x5b   :  { %827 = vmatpush1.bf16.msra.mxu0 %v1551_v34  ;;  %1391 = vmatprep.subr.bf16.mxu1 %v1560_v38  ;;  %v1596_v38 = vld [vmem:[#allocation4 + $0x1b0] ss:$12 sps:$4 sm:$0xff]  }
  0x5c   :  { %828 = vmatprep.subr.bf16.mxu0 %v1553_v35  ;;  %v1592_v35 = vld [vmem:[#allocation4 + $0x198] ss:$12 sps:$4 sm:$0xff]  }
  0x5e   :  { %1392 = vmatpush3.bf16.msra.mxu1 %v1562_v40  ;;  %v1602_v40 = vld [vmem:[#allocation4 + $0x1cc] ss:$12 sps:$4 sm:$0xff]  }
  0x5f   :  { %829 = vmatpush1.bf16.msra.mxu0 %v1556_v36  ;;  %1393 = vmatprep.subr.bf16.mxu1 %v1565_v42  ;;  %v1595_v36 = vld [vmem:[#allocation4 + $0x1a0] ss:$12 sps:$4 sm:$0xff]   ;;  %v1603_v42 = vld [vmem:[#allocation4 + $0x1d0] ss:$12 sps:$4 sm:$0xff]  }
  0x60   :  { %830 = vmatprep.subr.bf16.mxu0 %v1558_v37  ;;  %v1598_v37 = vld [vmem:[#allocation4 + $0x1b4] ss:$12 sps:$4 sm:$0xff]  }
  0x62   :  { %1394 = vmatpush3.bf16.msra.mxu1 %v1567_v44  ;;  %v1607_v44 = vld [vmem:[#allocation4 + $0x1e8] ss:$12 sps:$4 sm:$0xff]  }
  0x63   :  { %831 = vmatpush1.bf16.msra.mxu0 %v1561_v39  ;;  %1395 = vmatprep.subr.bf16.mxu1 %v1570_v46  ;;  %v1599_v39 = vld [vmem:[#allocation4 + $0x1b8] ss:$12 sps:$4 sm:$0xff]   ;;  %v1610_v46 = vld [vmem:[#allocation4 + $0x1fc] ss:$12 sps:$4 sm:$0xff]  }
  0x64   :  { %832 = vmatprep.subr.bf16.mxu0 %v1563_v41  ;;  %v1600_v41 = vld [vmem:[#allocation4 + $0x1c8] ss:$12 sps:$4 sm:$0xff]  }
  0x66   :  { %1396 = vmatpush3.bf16.msra.mxu1 %v1572_v48  ;;  %v1611_v48 = vld [vmem:[#allocation4 + $0x200] ss:$12 sps:$4 sm:$0xff]  }
  0x67   :  { %833 = vmatpush1.bf16.msra.mxu0 %v1566_v43  ;;  %1397 = vmatprep.subr.bf16.mxu1 %v1575_v50  ;;  %v1606_v43 = vld [vmem:[#allocation4 + $0x1e4] ss:$12 sps:$4 sm:$0xff]   ;;  %v1614_v50 = vld [vmem:[#allocation4 + $0x214] ss:$12 sps:$4 sm:$0xff]  }
  0x68   :  { %834 = vmatprep.subr.bf16.mxu0 %v1568_v45  ;;  %v299_v45 = vsub.s32 2, %v1845_v4 }
  0x6a   :  { %1398 = vmatpush3.bf16.msra.mxu1 %v1577_v52  ;;  %v1615_v52 = vld [vmem:[#allocation4 + $0x218] ss:$12 sps:$4 sm:$0xff]  }
  0x6b   :  { %835 = vmatpush1.bf16.msra.mxu0 %v1571_v47  ;;  %1399 = vmatprep.subr.bf16.mxu1 %v1580_v54  ;;  %v1608_v47 = vld [vmem:[#allocation4 + $0x1f8] ss:$12 sps:$4 sm:$0xff]  }
  0x6c   :  { %836 = vmatprep.subr.bf16.mxu0 %v1573_v49  ;;  %v300_v49 = vrot.slane %v1851_v11, %v299_v45  ;;  %v1618_v54 = vld [vmem:[#allocation4 + $0x22c] ss:$12 sps:$4 sm:$0xff]   ;;  %v1633_v11 = vld [vmem:[#allocation6 + $0x60] sm:$0xff]  }
  0x6e   :  { %1400 = vmatpush3.bf16.msra.mxu1 %v1582_v56  ;;  %v1619_v56 = vld [vmem:[#allocation4 + $0x230] ss:$12 sps:$4 sm:$0xff]  }
  0x6f   :  { %837 = vmatpush1.bf16.msra.mxu0 %v1576_v51  ;;  %1401 = vmatprep.subr.bf16.mxu1 %v1585_v58  ;;  %v1612_v51 = vld [vmem:[#allocation4 + $0x210] ss:$12 sps:$4 sm:$0xff]  }
  0x70   :  { %838 = vmatprep.subr.bf16.mxu0 %v1578_v53 }
  0x72   :  { %1402 = vmatpush3.bf16.msra.mxu1 %v1587_v60  ;;  %v1621_v60 = vld [vmem:[#allocation6 + $0x40] sm:$0xff]  }
  0x73   :  { %839 = vmatpush1.bf16.msra.mxu0 %v1581_v55  ;;  %1461 = vmatprep.subr.bf16.mxu1 %v1724_v8  ;;  %v1616_v55 = vld [vmem:[#allocation4 + $0x228] ss:$12 sps:$4 sm:$0xff]  }
  0x74   :  { %840 = vmatprep.subr.bf16.mxu0 %v1583_v57 }
  0x77   :  { %841 = vmatpush1.bf16.msra.mxu0 %v1586_v59  ;;  %v1620_v59 = vld [vmem:[#allocation6 + $0x80] sm:$0xff]  }
  0x78   :  { %851 = vmatprep.subr.bf16.mxu0 %v1590_v61  ;;  %v1622_v61 = vld [vmem:[#allocation6] sm:$0xff]  }
 0x110   :  { %v139_v62 = vpop.f32.mrb[0].mxu1 }
 0x111   :  { %v141_v63 = vpop.f32.mrb[1].mxu1 }
 0x112   :  { %v143_v1 = vpop.f32.mrb[2].mxu1 }
 0x113   :  { %v144_v2 = vpop.f32.mrb[3].mxu1  ;;  %v1625_v1 = vld [vmem:[#allocation6 + $0x8] sm:$0xff]  }
 0x114   :  { %v1627_v2 = vld [vmem:[#allocation6 + $0x50] sm:$0xff]  }
 0x118   :  { %v180_v5 = vpop.f32.mrb[4].mxu1 }
 0x119   :  { %v1453_v6 = vpop.f32.mrb[5].mxu1 }
 0x11a   :  { %v183_v7 = vpop.f32.mrb[6].mxu1  ;;  %v1630_v6 = vld [vmem:[#allocation6 + $0x58] sm:$0xff]  }
 0x11b   :  { %v1454_v9 = vpop.f32.mrb[7].mxu1  ;;  %v1629_v7 = vld [vmem:[#allocation6 + $0x98] sm:$0xff]  }
 0x11c   :  { %v1631_v9 = vld [vmem:[#allocation6 + $0x18] sm:$0xff]  }
 0x120   :  { %v240_v14 = vpop.f32.mrb[8].mxu1 }
 0x121   :  { %v241_v16 = vadd.f32 %v240_v14, %v139_v62  ;;  %v242_v17 = vpop.f32.mrb[9].mxu1  ;;  %v1624_v62 = vld [vmem:[#allocation6 + $0x48] sm:$0xff]   ;;  %v1634_v14 = vld [vmem:[#allocation6 + $0x20] sm:$0xff]  }
 0x122   :  { %v243_v18 = vadd.f32 %v242_v17, %v141_v63  ;;  %v244_v19 = vpop.f32.mrb[10].mxu1  ;;  %v1623_v63 = vld [vmem:[#allocation6 + $0x88] sm:$0xff]  }
 0x123   :  { %v304_v20 = vadd.f32 %v292_v13, %v241_v16  ;;  %v245_v21 = vpop.f32.mrb[11].mxu1  ;;  %v1632_v13 = vld [vmem:[#allocation6 + $0xa0] sm:$0xff]   ;;  %v1635_v16 = vld [vmem:[#allocation6 + $0xa8] sm:$0xff]   ;;  %v1639_v19 = vld [vmem:[#allocation6 + $0x70] sm:$0xff]  }
 0x124   :  { %v305_v22 = vadd.f32 %v296_v15, %v243_v18  ;;  %v1636_v15 = vld [vmem:[#allocation6 + $0x68] sm:$0xff]   ;;  %v1638_v18 = vld [vmem:[#allocation6 + $0xb0] sm:$0xff]   ;;  %v1641_v21 = vld [vmem:[#allocation6 + $0xb8] sm:$0xff]  }
 0x125   :  { %v307_v23 = vmax.f32 %v304_v20, 0.0  ;;  %v1637_v17 = vld [vmem:[#allocation6 + $0x28] sm:$0xff]   ;;  %v1640_v20 = vld [vmem:[#allocation6 + $0x30] sm:$0xff]  }
 0x126   :  { %v308_v24 = vmax.f32 %v305_v22, 0.0  ;;  %v1642_v22 = vld [vmem:[#allocation6 + $0x78] sm:$0xff]  }
 0x127   :  { %v310_v29 = vpack.c.bf16 %v307_v23, %v307_v23  ;;  %v1643_v23 = vld [vmem:[#allocation6 + $0x38] sm:$0xff]  }
 0x128   :  { %v281_v25 = vpop.f32.mrb[12].mxu1  ;;  %v311_v26 = vpack.c.bf16 %v308_v24, %v308_v24 }
 0x129   :  { %v282_v30 = vadd.f32 %v281_v25, %v180_v5  ;;  %v1459_v32 = vpop.f32.mrb[13].mxu1  ;;  %v1628_v5 = vld [vmem:[#allocation6 + $0x10] sm:$0xff]  }
 0x12a   :  { %842 = vmatprep.mubr.bf16.mxu0 %v311_v26  ;;  %924 = vmatprep.mubr.bf16.mxu1 %v311_v26  ;;  %v284_v33 = vpop.f32.mrb[14].mxu1 }
 0x12b   :  { %843 = vmatmul.mubr.bf16.vlgmr.msra.gmra.mrb[0].mxu0 %v310_v29  ;;  %925 = vmatmul.mubr.bf16.vlgmr.msra.gmra.mrb[16].mxu1 %v310_v29  ;;  %v1460_v34 = vpop.f32.mrb[15].mxu1  ;;  %v306_v53 = vadd.f32 %v300_v49, %v282_v30  ;;  %v409_v29 = vld [vmem:[%s1908_s6] sm:$0x7] }
 0x12c   :  { %852 = vmatpush1.bf16.msra.mxu0 %v1588_v27  ;;  %1462 = vmatpush3.bf16.msra.mxu1 %v1591_v28  ;;  %v422_v30 = vrot.slane %v409_v29, %v299_v45 }
 0x12d   :  { %853 = vmatprep.subr.bf16.mxu0 %v1594_v31  ;;  %1463 = vmatprep.subr.bf16.mxu1 %v1724_v8  ;;  %v309_v57 = vmax.f32 %v306_v53, 0.0  ;;  %v418_v31 = vrot.slane %v409_v29, %v295_v12 }
 0x12e   :  { %883 = vmatprep.mubr.bf16.mxu0 %v1723_v0  ;;  %1477 = vmatprep.mubr.msk.bf16.mxu1 %vm1725_vm2, %v1724_v8  ;;  %v1604_v0 = vld [vmem:[#allocation4 + $0x1e0] ss:$12 sps:$4 sm:$0xff]  }
 0x12f   :  { %v312_v58 = vpack.c.bf16 %v309_v57, %v309_v57 }
 0x130   :  { %854 = vmatpush1.bf16.msra.mxu0 %v1592_v35  ;;  %1464 = vmatpush3.bf16.msra.mxu1 %v1595_v36 }
 0x131   :  { %855 = vmatprep.subr.bf16.mxu0 %v1598_v37  ;;  %1465 = vmatprep.subr.bf16.mxu1 %v1724_v8 }
 0x134   :  { %856 = vmatpush1.bf16.msra.mxu0 %v1596_v38  ;;  %1466 = vmatpush3.bf16.msra.mxu1 %v1599_v39 }
 0x135   :  { %857 = vmatprep.subr.bf16.mxu0 %v1602_v40  ;;  %1467 = vmatprep.subr.bf16.mxu1 %v1724_v8 }
 0x138   :  { %858 = vmatpush1.bf16.msra.mxu0 %v1600_v41  ;;  %1468 = vmatpush3.bf16.msra.mxu1 %v1603_v42 }
 0x139   :  { %859 = vmatprep.subr.bf16.mxu0 %v1606_v43  ;;  %1469 = vmatprep.subr.bf16.mxu1 %v1724_v8 }
 0x13c   :  { %860 = vmatpush1.bf16.msra.mxu0 %v1604_v0  ;;  %1470 = vmatpush3.bf16.msra.mxu1 %v1607_v44 }
 0x13d   :  { %861 = vmatprep.subr.bf16.mxu0 %v1610_v46  ;;  %1471 = vmatprep.subr.bf16.mxu1 %v1724_v8 }
 0x140   :  { %862 = vmatpush1.bf16.msra.mxu0 %v1608_v47  ;;  %1472 = vmatpush3.bf16.msra.mxu1 %v1611_v48 }
 0x141   :  { %863 = vmatprep.subr.bf16.mxu0 %v1614_v50  ;;  %1473 = vmatprep.subr.bf16.mxu1 %v1724_v8  ;;  %v1357_v50 = vld [vmem:[%s1910_s8] ss:$0 sm:$0xff] }
 0x144   :  { %864 = vmatpush1.bf16.msra.mxu0 %v1612_v51  ;;  %1474 = vmatpush3.bf16.msra.mxu1 %v1615_v52 }
 0x145   :  { %865 = vmatprep.subr.bf16.mxu0 %v1618_v54  ;;  %1475 = vmatprep.subr.bf16.mxu1 %v1724_v8 }
 0x148   :  { %866 = vmatpush1.bf16.msra.mxu0 %v1616_v55  ;;  %1476 = vmatpush3.bf16.msra.mxu1 %v1619_v56 }
 0x149   :  { %1481 = vmatprep.subr.bf16.mxu0 %v1724_v8  ;;  %1418 = vmatprep.subr.bf16.mxu1 %v1621_v60 }
 0x14b   :  { %884 = vmatmul.mubr.bf16.vlgmr.msra.gmra.mrb[0].mxu0 %v312_v58  ;;  %1478 = vmatmul.mubr.bf16.vlgmr.msra.gmra.mrb[20].mxu1 %v312_v58  ;;  %v1382_v58 = vld [vmem:[%s1911_s9] ss:$0 sm:$0xff] }
 0x14c   :  { %1497 = vmatprep.mubr.msk.bf16.mxu0 %vm1725_vm2, %v1724_v8  ;;  %1482 = vmatpush3.bf16.msra.mxu0 %v1620_v59 }
 0x14d   :  { %1419 = vmatpush3.bf16.msra.mxu1 %v1622_v61  ;;  %1483 = vmatprep.subr.bf16.mxu0 %v1724_v8 }
 0x14e   :  { %1420 = vmatprep.subr.bf16.mxu1 %v1624_v62 }
 0x150   :  { %1484 = vmatpush3.bf16.msra.mxu0 %v1623_v63 }
 0x151   :  { %1421 = vmatpush3.bf16.msra.mxu1 %v1625_v1  ;;  %1485 = vmatprep.subr.bf16.mxu0 %v1724_v8 }
 0x152   :  { %1422 = vmatprep.subr.bf16.mxu1 %v1627_v2 }
 0x154   :  { %1486 = vmatpush3.bf16.msra.mxu0 %v1626_v3 }
 0x155   :  { %1423 = vmatpush3.bf16.msra.mxu1 %v1628_v5  ;;  %1487 = vmatprep.subr.bf16.mxu0 %v1724_v8 }
 0x156   :  { %1424 = vmatprep.subr.bf16.mxu1 %v1630_v6 }
 0x158   :  { %1488 = vmatpush3.bf16.msra.mxu0 %v1629_v7 }
 0x159   :  { %1425 = vmatpush3.bf16.msra.mxu1 %v1631_v9  ;;  %1489 = vmatprep.subr.bf16.mxu0 %v1724_v8 }
 0x15a   :  { %1426 = vmatprep.subr.bf16.mxu1 %v1633_v11 }
 0x15c   :  { %1490 = vmatpush3.bf16.msra.mxu0 %v1632_v13 }
 0x15d   :  { %1427 = vmatpush3.bf16.msra.mxu1 %v1634_v14  ;;  %1491 = vmatprep.subr.bf16.mxu0 %v1724_v8 }
 0x15e   :  { %1428 = vmatprep.subr.bf16.mxu1 %v1636_v15 }
 0x160   :  { %1492 = vmatpush3.bf16.msra.mxu0 %v1635_v16 }
 0x161   :  { %1429 = vmatpush3.bf16.msra.mxu1 %v1637_v17  ;;  %1493 = vmatprep.subr.bf16.mxu0 %v1724_v8 }
 0x162   :  { %1430 = vmatprep.subr.bf16.mxu1 %v1639_v19 }
 0x164   :  { %1494 = vmatpush3.bf16.msra.mxu0 %v1638_v18 }
 0x165   :  { %1495 = vmatprep.subr.bf16.mxu0 %v1724_v8  ;;  %1431 = vmatpush3.bf16.msra.mxu1 %v1640_v20  ;;  %v414_v8 = vrot.slane %v409_v29, %v291_v10 }
 0x166   :  { %1432 = vmatprep.subr.bf16.mxu1 %v1642_v22 }
 0x168   :  { %1496 = vmatpush3.bf16.msra.mxu0 %v1641_v21 }
 0x169   :  { %1433 = vmatpush3.bf16.msra.mxu1 %v1643_v23 }
 0x1fe   :  { %v1403_v24 = vpop.f32.mrb[16].mxu1 }
 0x1ff   :  { %v1404_v25 = vpop.f32.mrb[17].mxu1 }
 0x200   :  { %v1405_v26 = vadd.f32 %v1404_v25, %v1403_v24  ;;  %v1406_v27 = vpop.f32.mrb[18].mxu1 }
 0x201   :  { %v1407_v28 = vpop.f32.mrb[19].mxu1 }
 0x202   :  { %v927_v32 = vadd.f32 %v1405_v26, %v422_v30 }
 0x21e   :  { %v885_v33 = vpop.f32.mrb[0].mxu0  ;;  %v966_v34 = vpop.f32.mrb[20].mxu1 }
 0x21f   :  { %v1501_v35 = vadd.f32 %v885_v33, %v414_v8  ;;  %v967_v36 = vadd.f32 %v966_v34, %v927_v32  ;;  %v887_v37 = vpop.f32.mrb[1].mxu0  ;;  %v1479_v38 = vpop.f32.mrb[21].mxu1 }
 0x220   :  { %v1502_v39 = vadd.f32 %v887_v37, %v418_v31  ;;  %v889_v40 = vpop.f32.mrb[2].mxu0  ;;  %v969_v41 = vpop.f32.mrb[22].mxu1 }
 0x221   :  { %v972_v42 = vmax.f32 %v1501_v35, 0.0  ;;  %v974_v43 = vmax.f32 %v967_v36, 0.0  ;;  %v890_v0 = vpop.f32.mrb[3].mxu0  ;;  %v1480_v44 = vpop.f32.mrb[23].mxu1 }
 0x222   :  { %v973_v45 = vmax.f32 %v1502_v39, 0.0 }
 0x223   :  { %v977_v46 = vpack.c.bf16 %v974_v43, %v974_v43  ;;  %v975_v47 = vpack.c.bf16 %v972_v42, %v972_v42 }
 0x224   :  { %v976_v10 = vpack.c.bf16 %v973_v45, %v973_v45 }
 0x225   :  { %1498 = vmatmul.mubr.bf16.vlgmr.msra.gmra.mrb[4].mxu0 %v977_v46 }
 0x226   :  { %1209 = vmatprep.mubr.bf16.mxu1 %v976_v10 }
 0x227   :  { %1210 = vmatmul.mubr.bf16.vlgmr.msra.gmra.mrb[24].mxu1 %v975_v47 }
 0x2f8   :  { %v1251_v4 = vpop.f32.mrb[4].mxu0 }
 0x2f9   :  { %v1499_v12 = vpop.f32.mrb[5].mxu0 }
 0x2fa   :  { %v1434_v48 = vpop.f32.mrb[24].mxu1  ;;  %v1254_v49 = vpop.f32.mrb[6].mxu0 }
 0x2fb   :  { %v1435_v51 = vpop.f32.mrb[25].mxu1  ;;  %v1500_v52 = vpop.f32.mrb[7].mxu0 }
 0x2fc   :  { %v1436_v53 = vadd.f32 %v1435_v51, %v1434_v48  ;;  %v1437_v54 = vpop.f32.mrb[26].mxu1 }
 0x2fd   :  { %v1438_v55 = vpop.f32.mrb[27].mxu1 }
 0x2fe   :  { %v1212_v56 = vadd.f32 %v1436_v53, %v1357_v50 }
 0x300   :  { %v1252_v57 = vadd.f32 %v1251_v4, %v1212_v56 }
 0x302   :  { %1644 = vtanh.f32 %v1252_v57 }
 0x30c   :  { %v1645_v59 = vpop.eup %1644 }
 0x30d   :  { %v1265_v60 = vmul.f32 %v1645_v59, %v1382_v58 }
 0x30f   :  { %v1266_v61 = vpack.c.bf16 %v1265_v60, %v1265_v60 }
 0x311   :  { %1267 = vst [vmem:[%s1912_s10] sm:$0xf] %v1266_v61 }
 0x312   :  { %1272 = vsyncpa [#allocation3], 1 }
 0x313   :  { %1273 = vsyncpa [#allocation5], 1 }

</bundles_post_ra>
